<compile_context>
chip_gen: v7x
topology: tpu7x:2x2x1
jax: 0.10.0
libtpu: 0.0.40
codegen_flags: <defaults>
</compile_context>

<pallas_src>
import functools
import math

import jax
import jax.numpy as jnp
from jax.experimental import pallas as pl
from jax.experimental.pallas import tpu as pltpu


def _round_up(x, m):
    return ((x + m - 1) // m) * m


def _pick_lane_tile(l_pad, cap):
    """Largest multiple-of-128 divisor of l_pad (a multiple of 128) that is <= cap."""
    n128 = l_pad // 128
    k_max = max(1, min(cap // 128, n128))
    for k in range(k_max, 0, -1):
        if n128 % k == 0:
            return 128 * k
    return 128


# ---------------------------------------------------------------------------
# Fused path (stride == 1): conv-style cdist, no unfold matrix in HBM.
# ---------------------------------------------------------------------------
def _fused_cdist_kernel(x_ref, wmat_ref, wn_ref, o_ref, *, kh, kw, wp, s_out,
                        n_ch, n_ch_pad):
    # x_ref   : (C, S_in)          one image plane, spatially padded + flattened
    # wmat_ref: (kh*kw, O, C_pad)  per-tap -2 * weight^2 (resident across grid)
    # wn_ref  : (O, 1)             ||weight^2||^2 per output channel (resident)
    # o_ref   : (O, S_out)         lane-flattened output plane (rows of length Wp)
    xs = x_ref[...]
    if n_ch_pad > n_ch:
        # Zero-pad channels so the MXU contraction dim is a full sublane multiple.
        xs = jnp.concatenate(
            [xs, jnp.zeros((n_ch_pad - n_ch, xs.shape[1]), xs.dtype)], axis=0)
    s2 = jnp.sum(xs * xs, axis=0, keepdims=True)            # (1, S_in) per-pixel ||x||^2
    n_out = o_ref.shape[0]
    acc = jnp.zeros((n_out, s_out), jnp.float32)             # -2 * <patch, w^2>
    xn = jnp.zeros((1, s_out), jnp.float32)                  # ||patch||^2
    for i in range(kh):                                      # static unroll: kh*kw taps
        for j in range(kw):
            d = i * wp + j                                   # static lane shift
            w_ij = wmat_ref[i * kw + j]                      # (O, C_pad)
            acc = acc + jnp.dot(w_ij, xs[:, d:d + s_out],
                                preferred_element_type=jnp.float32)   # MXU
            xn = xn + s2[:, d:d + s_out]                     # VPU
    d2 = acc + xn + wn_ref[...]
    o_ref[...] = jnp.sqrt(jnp.maximum(d2, 0.0))


def _gray_conv2d_fused(x, w2, kh, kw, padding, *, fuse_vmem_cap=12 * 1024 * 1024):
    """stride==1 fast path.  Returns None if the per-image planes don't fit VMEM."""
    n, c, h, w = x.shape
    o = w2.shape[0]
    hp, wp = h + 2 * padding, w + 2 * padding
    oh, ow = hp - kh + 1, wp - kw + 1
    if oh <= 0 or ow <= 0:
        return None
    s_in = hp * wp + (kw - 1)     # guard lanes keep every shifted slice in bounds
    s_out = oh * wp               # rows of length Wp; last kw-1 cols per row are garbage
    c_pad = _round_up(c, 8)

    est = 4 * (4 * c_pad * s_in + 4 * o * s_out + 2 * s_in + kh * kw * o * c_pad + o)
    if est > fuse_vmem_cap:
        return None               # caller falls back to the tiled unfold path

    if padding > 0:
        x = jnp.pad(x, ((0, 0), (0, 0), (padding, padding), (padding, padding)))
    xflat = x.reshape(n, c, hp * wp)
    if kw > 1:
        xflat = jnp.pad(xflat, ((0, 0), (0, 0), (0, kw - 1)))

    # Hoisted weight-side prep: per-tap (O, C) blocks of -2*w^2 and ||w^2||^2.
    w4 = w2.reshape(o, c, kh, kw)
    wmat = jnp.transpose(-2.0 * w4, (2, 3, 0, 1)).reshape(kh * kw, o, c)
    if c_pad > c:
        wmat = jnp.pad(wmat, ((0, 0), (0, 0), (0, c_pad - c)))
    wn = jnp.sum(w2 * w2, axis=-1, keepdims=True)

    kernel = functools.partial(_fused_cdist_kernel, kh=kh, kw=kw, wp=wp,
                               s_out=s_out, n_ch=c, n_ch_pad=c_pad)
    vmem_limit = min(max(2 * est, 8 * 1024 * 1024), 32 * 1024 * 1024)
    out = pl.pallas_call(
        kernel,
        out_shape=jax.ShapeDtypeStruct((n, o, s_out), jnp.float32),
        grid_spec=pltpu.PrefetchScalarGridSpec(
            num_scalar_prefetch=0,
            grid=(n,),
            in_specs=[
                pl.BlockSpec((None, c, s_in), lambda b: (b, 0, 0)),
                pl.BlockSpec((kh * kw, o, c_pad), lambda b: (0, 0, 0)),
                pl.BlockSpec((o, 1), lambda b: (0, 0)),
            ],
            out_specs=pl.BlockSpec((None, o, s_out), lambda b: (b, 0, 0)),
        ),
        compiler_params=pltpu.CompilerParams(
            dimension_semantics=("parallel",),
            vmem_limit_bytes=vmem_limit),
    )(xflat, wmat, wn)

    # (N, O, OH*Wp) -> (N, O, OH, Wp) is a free reshape; dropping the kw-1
    # wrap-around columns per row is the only output-sized copy in this path.
    return out.reshape(n, o, oh, wp)[..., :ow]


# ---------------------------------------------------------------------------
# General tiled path: Gram-trick cdist over an explicit [B, K, L] patch matrix.
# ---------------------------------------------------------------------------
def _tiled_cdist_kernel(x_ref, w2m_ref, wn_ref, o_ref):
    # x_ref : (K, TL)  patch tile   w2m_ref: (O, K) = -2*weight^2   wn_ref: (O, 1)
    x = x_ref[...]
    xw = jnp.dot(w2m_ref[...], x, preferred_element_type=jnp.float32)   # (O, TL) MXU
    xn = jnp.sum(x * x, axis=0, keepdims=True)                          # (1, TL)
    o_ref[...] = jnp.sqrt(jnp.maximum(xw + xn + wn_ref[...], 0.0))


def _gray_conv2d_tiled(windows, w2, *, tile_cap=2048):
    """windows: [B, K, L] f32 (unfold layout) -> [B, O, L] distances."""
    b, k, l = windows.shape
    o = w2.shape[0]
    l_pad = _round_up(l, 128)         # bounded <=127 dead lanes; fuses into the unfold fusion
    if l_pad != l:
        windows = jnp.pad(windows, ((0, 0), (0, 0), (0, l_pad - l)))
    # Keep the double-buffered patch block under ~4 MiB, then pick the largest
    # multiple-of-128 lane tile that exactly divides l_pad (no tile-sized
    # over-padding, no partial input blocks).
    cap = max(128, min(tile_cap, (4 * 1024 * 1024 // (k * 8)) // 128 * 128))
    tile_l = _pick_lane_tile(l_pad, cap)

    w2m = (-2.0 * w2).astype(jnp.float32)                    # fold the -2 into the weights
    wn = jnp.sum(w2 * w2, axis=-1, keepdims=True).astype(jnp.float32)

    block_bytes = 2 * (k * tile_l + o * tile_l) * 4
    const_bytes = 2 * (o * k + o) * 4
    vmem_limit = min(max(4 * (block_bytes + const_bytes), 4 * 1024 * 1024),
                     32 * 1024 * 1024)

    grid = (b, l_pad // tile_l)
    return pl.pallas_call(
        _tiled_cdist_kernel,
        # Output at true L: the tail lane block is a masked partial write, so no
        # post-kernel slice copy is needed.
        out_shape=jax.ShapeDtypeStruct((b, o, l), jnp.float32),
        grid_spec=pltpu.PrefetchScalarGridSpec(
            num_scalar_prefetch=0,
            grid=grid,
            in_specs=[
                pl.BlockSpec((None, k, tile_l), lambda i, j: (i, 0, j)),
                pl.BlockSpec((o, k), lambda i, j: (0, 0)),
                pl.BlockSpec((o, 1), lambda i, j: (0, 0)),
            ],
            out_specs=pl.BlockSpec((None, o, tile_l), lambda i, j: (i, 0, j)),
        ),
        compiler_params=pltpu.CompilerParams(
            dimension_semantics=("parallel", "parallel"),
            vmem_limit_bytes=vmem_limit),
    )(windows, w2m, wn)


# ---------------------------------------------------------------------------
# Glue: im2col (identical ordering to torch.nn.functional.unfold).
# ---------------------------------------------------------------------------
def _unfold_patches(x, kh, kw, stride, padding):
    """x: [N, C, H, W] -> patches [N, C, kh*kw, OH, OW] (torch F.unfold ordering)."""
    n, c, h, w = x.shape
    if padding > 0:
        x = jnp.pad(x, ((0, 0), (0, 0), (padding, padding), (padding, padding)))
    oh = (h + 2 * padding - kh) // stride + 1
    ow = (w + 2 * padding - kw) // stride + 1
    slabs = []
    for i in range(kh):
        for j in range(kw):
            slabs.append(x[:, :, i:i + stride * oh:stride, j:j + stride * ow:stride])
    p = jnp.stack(slabs, axis=2)                   # [N, C, kh*kw, OH, OW]
    return p, oh, ow


def gray_conv2d_forward(x, weight, *, kernel_size, stride, padding, tile_cap=2048):
    x = x.astype(jnp.float32)
    kh, kw = kernel_size
    n, c = x.shape[0], x.shape[1]
    o = weight.shape[0]
    w2 = (weight.astype(jnp.float32)) ** 2

    if stride == 1:
        out = _gray_conv2d_fused(x, w2, kh, kw, padding)
        if out is not None:
            return out

    # General fallback (stride > 1 or planes too big for the fused path):
    # explicit im2col feeding the tiled Gram-trick cdist kernel.
    p, oh, ow = _unfold_patches(x, kh, kw, stride, padding)
    k = c * kh * kw
    l = oh * ow
    if l < tile_cap:
        # Small feature maps: fold the batch into the lane axis so lane tiles
        # are full and the grid is long enough to shard across cores.
        windows = jnp.transpose(p, (1, 2, 0, 3, 4)).reshape(1, k, n * l)
        dist = _gray_conv2d_tiled(windows, w2, tile_cap=tile_cap)       # [1, O, N*L]
        dist = dist.reshape(o, n, oh, ow)
        return jnp.transpose(dist, (1, 0, 2, 3))
    windows = p.reshape(n, k, l)
    dist = _gray_conv2d_tiled(windows, w2, tile_cap=tile_cap)           # [N, O, L]
    return dist.reshape(n, o, oh, ow)


# ---------------------------------------------------------------------------
# Module equivalent
# ---------------------------------------------------------------------------
class GrayConv2dPallas:
    """JAX/Pallas equivalent of Gray_Conv2d(conv_method='cdist')."""

    def __init__(self, in_channels, out_channels, kernel_size, stride=1,
                 padding=0, initial="kaiming", key=None, tile_cap=2048):
        self.in_channels = in_channels
        self.out_channels = out_channels
        self.kernel_size = (kernel_size, kernel_size)
        self.stride = (stride, stride)
        self.padding = padding
        fan_in = in_channels * kernel_size * kernel_size
        if key is None:
            key = jax.random.PRNGKey(0)
        if initial == "kaiming":
            # torch.nn.init.kaiming_uniform_ defaults: a=0, leaky_relu -> gain=sqrt(2)
            bound = math.sqrt(2.0) * math.sqrt(3.0 / fan_in)
            self.weight = jax.random.uniform(
                key, (out_channels, fan_in), jnp.float32, -bound, bound)
        elif initial == "uniform":
            self.weight = jax.random.uniform(
                key, (out_channels, fan_in), jnp.float32, 0.0, 1.0)
        else:
            raise ValueError("RBF_Conv2d initial error")
        self._forward = jax.jit(functools.partial(
            gray_conv2d_forward, kernel_size=self.kernel_size,
            stride=self.stride[0], padding=self.padding, tile_cap=tile_cap))

    def __call__(self, x):
        # x: [N, C, H, W] (NCHW, like the PyTorch module)
        return self._forward(x, self.weight)


# ---------------------------------------------------------------------------
# Pure-JAX reference for verification (direct-difference cdist)
# ---------------------------------------------------------------------------
def _reference(x, weight, kernel_size, stride, padding, out_channels):
    kh, kw = kernel_size
    p, oh, ow = _unfold_patches(x.astype(jnp.float32), kh, kw, stride, padding)
    n, c = x.shape[0], x.shape[1]
    k = c * kh * kw
    win = p.reshape(n, k, oh * ow).transpose(0, 2, 1)          # [N, L, K]
    w2 = weight.astype(jnp.float32) ** 2                       # [O, K]
    diff = win[:, :, None, :] - w2[None, None, :, :]           # [N, L, O, K]
    dist = jnp.sqrt(jnp.sum(diff * diff, axis=-1))             # [N, L, O]
    return dist.transpose(0, 2, 1).reshape(n, out_channels, oh, ow)


if __name__ == "__main__":
    key = jax.random.PRNGKey(0)
    k1, k2, k3, k4, k5, k6 = jax.random.split(key, 6)

    # --- Case 1: stride 1, no padding -> fused conv-style kernel (no unfold in HBM)
    N, C, H, W = 2, 4, 16, 16
    O1, ks1 = 8, 3
    x1 = jax.random.normal(k1, (N, C, H, W), jnp.float32)
    m1 = GrayConv2dPallas(C, O1, ks1, stride=1, padding=0, initial="kaiming", key=k2)
    o1 = jax.block_until_ready(m1(x1))
    r1 = _reference(x1, m1.weight, m1.kernel_size, 1, 0, O1)
    assert o1.shape == (N, O1, 14, 14), o1.shape
    assert jnp.allclose(o1, r1, atol=5e-4, rtol=5e-4), float(jnp.max(jnp.abs(o1 - r1)))

    # --- Case 2: stride 2 + padding -> tiled cdist path, batch folded into lanes
    x2 = jax.random.normal(k3, (2, 3, 16, 16), jnp.float32)
    m2 = GrayConv2dPallas(3, 16, 5, stride=2, padding=2, initial="uniform", key=k4)
    o2 = jax.block_until_ready(m2(x2))
    r2 = _reference(x2, m2.weight, m2.kernel_size, 2, 2, 16)
    assert o2.shape == r2.shape, (o2.shape, r2.shape)
    assert jnp.allclose(o2, r2, atol=5e-4, rtol=5e-4), float(jnp.max(jnp.abs(o2 - r2)))

    # --- Case 3: single (gray) channel + padding -> fused path w/ in-kernel channel pad
    x3 = jax.random.normal(k5, (2, 1, 16, 16), jnp.float32)
    m3 = GrayConv2dPallas(1, 8, 5, stride=1, padding=2, initial="kaiming", key=k6)
    o3 = jax.block_until_ready(m3(x3))
    r3 = _reference(x3, m3.weight, m3.kernel_size, 1, 2, 8)
    assert o3.shape == (2, 8, 16, 16), o3.shape
    assert jnp.allclose(o3, r3, atol=5e-4, rtol=5e-4), float(jnp.max(jnp.abs(o3 - r3)))

    print("KERNEL_OK")
</pallas_src>

<mosaic_0001>
module attributes {stable_mosaic.version = 11 : i64} {
  func.func @_fused_cdist_kernel(%arg0: i32, %arg1: memref<1x4x258xf32, #tpu.memory_space<vmem>>, %arg2: memref<9x8x8xf32, #tpu.memory_space<vmem>>, %arg3: memref<8x1xf32, #tpu.memory_space<vmem>>, %arg4: memref<1x8x224xf32, #tpu.memory_space<vmem>>) attributes {dimension_semantics = [#tpu.dimension_semantics<parallel>], iteration_bounds = array<i64: 2>, scalar_prefetch = 0 : i64, scratch_operands = 0 : i64, tpu.core_type = #tpu.core_type<tc>, window_params = [{transform_indices = @transform_0, window_bounds = array<i64: 1, 4, 258>}, {pipeline_mode = #tpu.pipeline_mode<synchronous>, transform_indices = @transform_1, window_bounds = array<i64: 9, 8, 8>}, {pipeline_mode = #tpu.pipeline_mode<synchronous>, transform_indices = @transform_2, window_bounds = array<i64: 8, 1>}, {transform_indices = @transform_3, window_bounds = array<i64: 1, 8, 224>}]} {
    %c0 = arith.constant 0 : index
    %c0_0 = arith.constant 0 : index
    %c0_1 = arith.constant 0 : index
    %0 = vector.load %arg1[%c0, %c0_0, %c0_1] : memref<1x4x258xf32, #tpu.memory_space<vmem>>, vector<1x4x258xf32>
    %1 = vector.shape_cast %0 : vector<1x4x258xf32> to vector<4x258xf32>
    %cst = arith.constant 0.000000e+00 : f32
    %2 = vector.broadcast %cst : f32 to vector<4x258xf32>
    %3 = tpu.concatenate %1, %2 in 0 : vector<4x258xf32>, vector<4x258xf32> -> vector<8x258xf32>
    %4 = arith.mulf %3, %3 : vector<8x258xf32>
    %cst_2 = arith.constant dense<0.000000e+00> : vector<258xf32>
    %5 = vector.multi_reduction <add>, %4, %cst_2 [0] : vector<8x258xf32> to vector<258xf32>
    %6 = vector.shape_cast %5 : vector<258xf32> to vector<1x258xf32>
    %cst_3 = arith.constant 0.000000e+00 : f32
    %7 = vector.broadcast %cst_3 : f32 to vector<8x224xf32>
    %cst_4 = arith.constant 0.000000e+00 : f32
    %8 = vector.broadcast %cst_4 : f32 to vector<1x224xf32>
    %c0_5 = arith.constant 0 : index
    %c0_6 = arith.constant 0 : index
    %c0_7 = arith.constant 0 : index
    %9 = vector.load %arg2[%c0_5, %c0_6, %c0_7] : memref<9x8x8xf32, #tpu.memory_space<vmem>>, vector<1x8x8xf32>
    %10 = vector.shape_cast %9 : vector<1x8x8xf32> to vector<8x8xf32>
    %11 = vector.extract_strided_slice %3 {offsets = [0, 0], sizes = [8, 224], strides = [1, 1]} : vector<8x258xf32> to vector<8x224xf32>
    %cst_8 = arith.constant dense<0.000000e+00> : vector<8x224xf32>
    %12 = tpu.matmul %10, %11, %cst_8 {dimension_numbers = #tpu.dot_dimension_numbers<[1], [0], [0], [1], [0, 0, 1, 1], [], []>} : vector<8x8xf32>, vector<8x224xf32>, vector<8x224xf32> -> vector<8x224xf32>
    %13 = arith.addf %7, %12 : vector<8x224xf32>
    %14 = vector.extract_strided_slice %6 {offsets = [0, 0], sizes = [1, 224], strides = [1, 1]} : vector<1x258xf32> to vector<1x224xf32>
    %15 = arith.addf %8, %14 : vector<1x224xf32>
    %c1 = arith.constant 1 : index
    %c0_9 = arith.constant 0 : index
    %c0_10 = arith.constant 0 : index
    %16 = vector.load %arg2[%c1, %c0_9, %c0_10] : memref<9x8x8xf32, #tpu.memory_space<vmem>>, vector<1x8x8xf32>
    %17 = vector.shape_cast %16 : vector<1x8x8xf32> to vector<8x8xf32>
    %18 = vector.extract_strided_slice %3 {offsets = [0, 1], sizes = [8, 224], strides = [1, 1]} : vector<8x258xf32> to vector<8x224xf32>
    %cst_11 = arith.constant dense<0.000000e+00> : vector<8x224xf32>
    %19 = tpu.matmul %17, %18, %cst_11 {dimension_numbers = #tpu.dot_dimension_numbers<[1], [0], [0], [1], [0, 0, 1, 1], [], []>} : vector<8x8xf32>, vector<8x224xf32>, vector<8x224xf32> -> vector<8x224xf32>
    %20 = arith.addf %13, %19 : vector<8x224xf32>
    %21 = vector.extract_strided_slice %6 {offsets = [0, 1], sizes = [1, 224], strides = [1, 1]} : vector<1x258xf32> to vector<1x224xf32>
    %22 = arith.addf %15, %21 : vector<1x224xf32>
    %c2 = arith.constant 2 : index
    %c0_12 = arith.constant 0 : index
    %c0_13 = arith.constant 0 : index
    %23 = vector.load %arg2[%c2, %c0_12, %c0_13] : memref<9x8x8xf32, #tpu.memory_space<vmem>>, vector<1x8x8xf32>
    %24 = vector.shape_cast %23 : vector<1x8x8xf32> to vector<8x8xf32>
    %25 = vector.extract_strided_slice %3 {offsets = [0, 2], sizes = [8, 224], strides = [1, 1]} : vector<8x258xf32> to vector<8x224xf32>
    %cst_14 = arith.constant dense<0.000000e+00> : vector<8x224xf32>
    %26 = tpu.matmul %24, %25, %cst_14 {dimension_numbers = #tpu.dot_dimension_numbers<[1], [0], [0], [1], [0, 0, 1, 1], [], []>} : vector<8x8xf32>, vector<8x224xf32>, vector<8x224xf32> -> vector<8x224xf32>
    %27 = arith.addf %20, %26 : vector<8x224xf32>
    %28 = vector.extract_strided_slice %6 {offsets = [0, 2], sizes = [1, 224], strides = [1, 1]} : vector<1x258xf32> to vector<1x224xf32>
    %29 = arith.addf %22, %28 : vector<1x224xf32>
    %c3 = arith.constant 3 : index
    %c0_15 = arith.constant 0 : index
    %c0_16 = arith.constant 0 : index
    %30 = vector.load %arg2[%c3, %c0_15, %c0_16] : memref<9x8x8xf32, #tpu.memory_space<vmem>>, vector<1x8x8xf32>
    %31 = vector.shape_cast %30 : vector<1x8x8xf32> to vector<8x8xf32>
    %32 = vector.extract_strided_slice %3 {offsets = [0, 16], sizes = [8, 224], strides = [1, 1]} : vector<8x258xf32> to vector<8x224xf32>
    %cst_17 = arith.constant dense<0.000000e+00> : vector<8x224xf32>
    %33 = tpu.matmul %31, %32, %cst_17 {dimension_numbers = #tpu.dot_dimension_numbers<[1], [0], [0], [1], [0, 0, 1, 1], [], []>} : vector<8x8xf32>, vector<8x224xf32>, vector<8x224xf32> -> vector<8x224xf32>
    %34 = arith.addf %27, %33 : vector<8x224xf32>
    %35 = vector.extract_strided_slice %6 {offsets = [0, 16], sizes = [1, 224], strides = [1, 1]} : vector<1x258xf32> to vector<1x224xf32>
    %36 = arith.addf %29, %35 : vector<1x224xf32>
    %c4 = arith.constant 4 : index
    %c0_18 = arith.constant 0 : index
    %c0_19 = arith.constant 0 : index
    %37 = vector.load %arg2[%c4, %c0_18, %c0_19] : memref<9x8x8xf32, #tpu.memory_space<vmem>>, vector<1x8x8xf32>
    %38 = vector.shape_cast %37 : vector<1x8x8xf32> to vector<8x8xf32>
    %39 = vector.extract_strided_slice %3 {offsets = [0, 17], sizes = [8, 224], strides = [1, 1]} : vector<8x258xf32> to vector<8x224xf32>
    %cst_20 = arith.constant dense<0.000000e+00> : vector<8x224xf32>
    %40 = tpu.matmul %38, %39, %cst_20 {dimension_numbers = #tpu.dot_dimension_numbers<[1], [0], [0], [1], [0, 0, 1, 1], [], []>} : vector<8x8xf32>, vector<8x224xf32>, vector<8x224xf32> -> vector<8x224xf32>
    %41 = arith.addf %34, %40 : vector<8x224xf32>
    %42 = vector.extract_strided_slice %6 {offsets = [0, 17], sizes = [1, 224], strides = [1, 1]} : vector<1x258xf32> to vector<1x224xf32>
    %43 = arith.addf %36, %42 : vector<1x224xf32>
    %c5 = arith.constant 5 : index
    %c0_21 = arith.constant 0 : index
    %c0_22 = arith.constant 0 : index
    %44 = vector.load %arg2[%c5, %c0_21, %c0_22] : memref<9x8x8xf32, #tpu.memory_space<vmem>>, vector<1x8x8xf32>
    %45 = vector.shape_cast %44 : vector<1x8x8xf32> to vector<8x8xf32>
    %46 = vector.extract_strided_slice %3 {offsets = [0, 18], sizes = [8, 224], strides = [1, 1]} : vector<8x258xf32> to vector<8x224xf32>
    %cst_23 = arith.constant dense<0.000000e+00> : vector<8x224xf32>
    %47 = tpu.matmul %45, %46, %cst_23 {dimension_numbers = #tpu.dot_dimension_numbers<[1], [0], [0], [1], [0, 0, 1, 1], [], []>} : vector<8x8xf32>, vector<8x224xf32>, vector<8x224xf32> -> vector<8x224xf32>
    %48 = arith.addf %41, %47 : vector<8x224xf32>
    %49 = vector.extract_strided_slice %6 {offsets = [0, 18], sizes = [1, 224], strides = [1, 1]} : vector<1x258xf32> to vector<1x224xf32>
    %50 = arith.addf %43, %49 : vector<1x224xf32>
    %c6 = arith.constant 6 : index
    %c0_24 = arith.constant 0 : index
    %c0_25 = arith.constant 0 : index
    %51 = vector.load %arg2[%c6, %c0_24, %c0_25] : memref<9x8x8xf32, #tpu.memory_space<vmem>>, vector<1x8x8xf32>
    %52 = vector.shape_cast %51 : vector<1x8x8xf32> to vector<8x8xf32>
    %53 = vector.extract_strided_slice %3 {offsets = [0, 32], sizes = [8, 224], strides = [1, 1]} : vector<8x258xf32> to vector<8x224xf32>
    %cst_26 = arith.constant dense<0.000000e+00> : vector<8x224xf32>
    %54 = tpu.matmul %52, %53, %cst_26 {dimension_numbers = #tpu.dot_dimension_numbers<[1], [0], [0], [1], [0, 0, 1, 1], [], []>} : vector<8x8xf32>, vector<8x224xf32>, vector<8x224xf32> -> vector<8x224xf32>
    %55 = arith.addf %48, %54 : vector<8x224xf32>
    %56 = vector.extract_strided_slice %6 {offsets = [0, 32], sizes = [1, 224], strides = [1, 1]} : vector<1x258xf32> to vector<1x224xf32>
    %57 = arith.addf %50, %56 : vector<1x224xf32>
    %c7 = arith.constant 7 : index
    %c0_27 = arith.constant 0 : index
    %c0_28 = arith.constant 0 : index
    %58 = vector.load %arg2[%c7, %c0_27, %c0_28] : memref<9x8x8xf32, #tpu.memory_space<vmem>>, vector<1x8x8xf32>
    %59 = vector.shape_cast %58 : vector<1x8x8xf32> to vector<8x8xf32>
    %60 = vector.extract_strided_slice %3 {offsets = [0, 33], sizes = [8, 224], strides = [1, 1]} : vector<8x258xf32> to vector<8x224xf32>
    %cst_29 = arith.constant dense<0.000000e+00> : vector<8x224xf32>
    %61 = tpu.matmul %59, %60, %cst_29 {dimension_numbers = #tpu.dot_dimension_numbers<[1], [0], [0], [1], [0, 0, 1, 1], [], []>} : vector<8x8xf32>, vector<8x224xf32>, vector<8x224xf32> -> vector<8x224xf32>
    %62 = arith.addf %55, %61 : vector<8x224xf32>
    %63 = vector.extract_strided_slice %6 {offsets = [0, 33], sizes = [1, 224], strides = [1, 1]} : vector<1x258xf32> to vector<1x224xf32>
    %64 = arith.addf %57, %63 : vector<1x224xf32>
    %c8 = arith.constant 8 : index
    %c0_30 = arith.constant 0 : index
    %c0_31 = arith.constant 0 : index
    %65 = vector.load %arg2[%c8, %c0_30, %c0_31] : memref<9x8x8xf32, #tpu.memory_space<vmem>>, vector<1x8x8xf32>
    %66 = vector.shape_cast %65 : vector<1x8x8xf32> to vector<8x8xf32>
    %67 = vector.extract_strided_slice %3 {offsets = [0, 34], sizes = [8, 224], strides = [1, 1]} : vector<8x258xf32> to vector<8x224xf32>
    %cst_32 = arith.constant dense<0.000000e+00> : vector<8x224xf32>
    %68 = tpu.matmul %66, %67, %cst_32 {dimension_numbers = #tpu.dot_dimension_numbers<[1], [0], [0], [1], [0, 0, 1, 1], [], []>} : vector<8x8xf32>, vector<8x224xf32>, vector<8x224xf32> -> vector<8x224xf32>
    %69 = arith.addf %62, %68 : vector<8x224xf32>
    %70 = vector.extract_strided_slice %6 {offsets = [0, 34], sizes = [1, 224], strides = [1, 1]} : vector<1x258xf32> to vector<1x224xf32>
    %71 = arith.addf %64, %70 : vector<1x224xf32>
    %72 = vector.broadcast %71 : vector<1x224xf32> to vector<8x224xf32>
    %73 = arith.addf %69, %72 : vector<8x224xf32>
    %c0_33 = arith.constant 0 : index
    %c0_34 = arith.constant 0 : index
    %74 = vector.load %arg3[%c0_33, %c0_34] : memref<8x1xf32, #tpu.memory_space<vmem>>, vector<8x1xf32>
    %75 = vector.broadcast %74 : vector<8x1xf32> to vector<8x224xf32>
    %76 = arith.addf %73, %75 : vector<8x224xf32>
    %cst_35 = arith.constant 0.000000e+00 : f32
    %77 = vector.broadcast %cst_35 : f32 to vector<8x224xf32>
    %78 = arith.maximumf %76, %77 : vector<8x224xf32>
    %79 = math.sqrt %78 : vector<8x224xf32>
    %c0_36 = arith.constant 0 : index
    %c0_37 = arith.constant 0 : index
    %c0_38 = arith.constant 0 : index
    %80 = vector.load %arg4[%c0_36, %c0_37, %c0_38] : memref<1x8x224xf32, #tpu.memory_space<vmem>>, vector<1x8x224xf32>
    %81 = vector.shape_cast %80 : vector<1x8x224xf32> to vector<8x224xf32>
    %82 = vector.shape_cast %79 : vector<8x224xf32> to vector<1x8x224xf32>
    tpu.vector_store %arg4[%c0_36, %c0_37, %c0_38], %82 {strides = array<i32>} : memref<1x8x224xf32, #tpu.memory_space<vmem>>, vector<1x8x224xf32>,
    return
  }
  func.func @transform_0(%arg0: i32) -> (i32, i32, i32) {
    %c0_i32 = arith.constant 0 : i32
    %c0_i32_0 = arith.constant 0 : i32
    %c0_i32_1 = arith.constant 0 : i32
    return %arg0, %c0_i32, %c0_i32_0 : i32, i32, i32
  }
  func.func @transform_1(%arg0: i32) -> (i32, i32, i32) {
    %c0_i32 = arith.constant 0 : i32
    %c0_i32_0 = arith.constant 0 : i32
    %c0_i32_1 = arith.constant 0 : i32
    %c0_i32_2 = arith.constant 0 : i32
    return %c0_i32, %c0_i32_0, %c0_i32_1 : i32, i32, i32
  }
  func.func @transform_2(%arg0: i32) -> (i32, i32) {
    %c0_i32 = arith.constant 0 : i32
    %c0_i32_0 = arith.constant 0 : i32
    %c0_i32_1 = arith.constant 0 : i32
    return %c0_i32, %c0_i32_0 : i32, i32
  }
  func.func @transform_3(%arg0: i32) -> (i32, i32, i32) {
    %c0_i32 = arith.constant 0 : i32
    %c0_i32_0 = arith.constant 0 : i32
    %c0_i32_1 = arith.constant 0 : i32
    return %arg0, %c0_i32, %c0_i32_0 : i32, i32, i32
  }
}

</mosaic_0001>

<bundles_post_ra>
// kernel: gray_conv2d_forward.1
= control target key start
LH: loop header
LB: loop body
LE: loop exit
PB: predicated region body
PF: predicated region fallthrough
CT: control target
= control target key end

     0   :  { %s1257_s12 = smov 0   ;;  %s1412_s0 = inlined_call_operand.vmem [shape: f32[2,4,258], index: 0, kind: input, shape index: {}]   ;;  %s1413_s1 = inlined_call_operand.vmem [shape: f32[9,8,8], index: 1, kind: input, shape index: {}]   ;;  %s1414_s2 = inlined_call_operand.vmem [shape: f32[8,1], index: 2, kind: input, shape index: {}]   ;;  %s1415_s3 = inlined_call_operand.vmem [shape: f32[2,8,224], index: 3, kind: output, shape index: {}]  }
   0x1 LB: > { %s1148_s13 = sadd.s32 4294967295, %s1225_s12   ;;  %p1152_p0 = scmp.ge.s32.totalorder %s1225_s12, 1  ;;  %s1225_s12 = sphi %s1257_s12, %s13_s12  }
   0x2   : > { %p137_p1 = scmp.lt.s32.totalorder %s1225_s12, 3 }
   0x4   : > { %p138_p2 = pnand %p1152_p0, %p137_p1 }
   0x5   : > { %p161_p3 = scmp.lt.s32.totalorder (!%p138_p2), %s1148_s13, 1  ;;  %v1227_v0 = vmov (!%p138_p2), 0.0   ;;  %vm176_vm0 = vcmask (!%p138_p2), 1043456   ;;  %s1228_s18 = smov (!%p138_p2), 127   ;;  %v1235_v15 = vmov (!%p138_p2), 0   ;;  %vm195_vm1 = vcmask (!%p138_p2), 15360  }
   0x6   : > { %141 = sbr.rel (%p138_p2) target bundleno = 409 (0x199), region = 32  ;;  %645 = vmatprep.mubr.f32.mxu0 (!%p138_p2), %v1227_v0  ;;  %286 = vmatprep.mubr.f32.mxu1 (!%p138_p2), %v1227_v0  ;;  %s1229_s19 = smov (!%p138_p2), 111   ;;  %v1067_v30 = vld [vmem:[%s1414_s2] sm:$0xff] (!%p138_p2)  ;;  %vm214_vm2 = vcmask (!%p138_p2), 1039360   ;;  %vm574_vm3 = vcmask (!%p138_p2), 908288   ;;  %vm218_vm4 = vcmask (!%p138_p2), 64512  }
   0x7   : > { %s1230_s20 = smov (!%p138_p2), 110   ;;  %s1231_s21 = smov (!%p138_p2), 96   ;;  %1213 = vset.pattern.permute.xlu0 (!%p138_p2), %v1235_v15  ;;  %v1165_v35 = vld [vmem:[%s1413_s1 + $0x20] sm:$0xff] (!%p138_p2)  ;;  %v1156_v36 = vld [vmem:[%s1413_s1 + $0x8] sm:$0xff] (!%p138_p2)  ;;  %vm669_vm5 = vcmask (!%p138_p2), 900096   ;;  %vm764_vm6 = vcmask (!%p138_p2), 785408  }
   0x8   : > { %s1232_s22 = smov (!%p138_p2), 95   ;;  %s1233_s23 = smov (!%p138_p2), 126   ;;  %v1167_v44 = vld [vmem:[%s1413_s1 + $0x28] sm:$0xff] (!%p138_p2)  ;;  %v203_v45 = vld [vmem:[%s1413_s1] sm:$0xff] (!%p138_p2)  ;;  %vm862_vm7 = vcmask (!%p138_p2), 777216   ;;  %vm384_vm8 = vcmask (!%p138_p2), 1031168  }
   0x9   : > { %s1234_s24 = smov (!%p138_p2), 94   ;;  %s1236_s25 = smov (!%p138_p2), 112   ;;  %v1169_v52 = vld [vmem:[%s1413_s1 + $0x30] sm:$0xff] (!%p138_p2)  ;;  %vm964_vm9 = vcmask (!%p138_p2), 769024   ;;  %v1171_v60 = vld [vmem:[%s1413_s1 + $0x38] sm:$0xff] (!%p138_p2)  ;;  %vm479_vm10 = vcmask (!%p138_p2), 916480  }
   0xa   : > { %v1161_v53 = vld [vmem:[%s1413_s1 + $0x10] sm:$0xff] (!%p138_p2) }
   0xd   : > { %s1417_s13 = smov (!%p161_p3, %s1148_s13), 1 }
   0xe   : > { %s1194_s14 = smul.u32 12, %s1417_s13 }
  0x10   : > { %s165_s17 = scalar_lea.vmem %s1412_s0, %s1194_s14 }
  0x11   : > { %v1273_v1 = vld [vmem:[%s165_s17] sm:$0xff]  ;;  %v172_v5 = vld [vmem:[%s165_s17 + $0x8] sm:$0xf] }
  0x12   : > { %v177_v2 = vsel %vm176_vm0, %v1273_v1, 0.0  ;;  %v1279_v3 = vcombine.high %v1273_v1, %v1273_v1  ;;  %v179_v8 = vsel %vm176_vm0, %v172_v5, 0.0 }
  0x13   : > { %210 = vrot.lane.b32.xlu1 %v177_v2, %s1228_s18  ;;  %570 = vrot.lane.b32.xlu0 %v177_v2, %s1229_s19  ;;  %v180_v6 = vmul.f32 %v177_v2, %v177_v2  ;;  %v182_v22 = vmul.f32 %v179_v8, %v179_v8 }
  0x14   : > { %v178_v4 = vsel %vm176_vm0, %v1279_v3, 0.0 }
  0x15   : > { %v181_v7 = vmul.f32 %v178_v4, %v178_v4  ;;  %v183_v9 = vrot.slane %v180_v6, 4  ;;  %v196_v23 = vsel %vm195_vm1, %v182_v22, 0.0 }
  0x16   : > { %v197_v24 = vrot.slane %v196_v23, 4 }
  0x17   : > { %212 = vrot.lane.b32.xlu1 %v178_v4, %s1228_s18  ;;  %572 = vrot.lane.b32.xlu0 %v178_v4, %s1229_s19  ;;  %v189_v10 = vrot.slane %v181_v7, 4  ;;  %v184_v11 = vadd.f32 %v183_v9, %v180_v6 }
  0x18   : > { %v198_v25 = vadd.f32 %v197_v24, %v196_v23 }
  0x19   : > { %v190_v12 = vadd.f32 %v189_v10, %v181_v7  ;;  %v185_v13 = vrot.slane %v184_v11, 2 }
  0x1a   : > { %v199_v26 = vrot.slane %v198_v25, 2 }
  0x1b   : > { %667 = vrot.lane.b32.xlu1 %v178_v4, %s1230_s20  ;;  %665 = vrot.lane.b32.xlu0 %v177_v2, %s1230_s20  ;;  %v191_v14 = vrot.slane %v190_v12, 2  ;;  %v186_v16 = vadd.f32 %v185_v13, %v184_v11 }
  0x1c   : > { %v200_v27 = vadd.f32 %v199_v26, %v198_v25 }
  0x1d   : > { %v192_v17 = vadd.f32 %v191_v14, %v190_v12  ;;  %v187_v18 = vrot.slane %v186_v16, 1 }
  0x1e   : > { %v201_v28 = vrot.slane %v200_v27, 1 }
  0x1f   : > { %762 = vrot.lane.b32.xlu1 %v178_v4, %s1231_s21  ;;  %760 = vrot.lane.b32.xlu0 %v177_v2, %s1231_s21  ;;  %v193_v19 = vrot.slane %v192_v17, 1  ;;  %v1298_v20 = vadd.f32 %v187_v18, %v186_v16 }
  0x20   : > { %v202_v29 = vadd.f32 %v201_v28, %v200_v27 }
  0x21   : > { %v1300_v21 = vadd.f32 %v193_v19, %v192_v17 }
  0x23   : > { %860 = vrot.lane.b32.xlu1 %v179_v8, %s1232_s22  ;;  %858 = vrot.lane.b32.xlu0 %v178_v4, %s1232_s22 }
  0x27   : > { %382 = vrot.lane.b32.xlu1 %v178_v4, %s1233_s23  ;;  %380 = vrot.lane.b32.xlu0 %v177_v2, %s1233_s23 }
  0x2b   : > { %960 = vrot.lane.b32.xlu1 %v178_v4, %s1234_s24  ;;  %856 = vrot.lane.b32.xlu0 %v177_v2, %s1232_s22 }
  0x2f   : > { %475 = vrot.lane.b32.xlu1 %v177_v2, %s1236_s25  ;;  %962 = vrot.lane.b32.xlu0 %v179_v8, %s1234_s24 }
  0x33   : > { %958 = vrot.lane.b32.xlu1 %v177_v2, %s1234_s24  ;;  %477 = vrot.lane.b32.xlu0 %v178_v4, %s1236_s25  ;;  %v1173_v4 = vld [vmem:[%s1413_s1 + $0x40] sm:$0xff] }
  0x37   : > { %369 = vrot.lane.b32.xlu0 %v1298_v20, %s1228_s18  ;;  %371 = vrot.lane.b32.xlu1 %v1300_v21, %s1228_s18 }
  0x3b   : > { %464 = vrot.lane.b32.xlu0 %v1298_v20, %s1233_s23  ;;  %466 = vrot.lane.b32.xlu1 %v1300_v21, %s1233_s23 }
  0x3f   : > { %559 = vrot.lane.b32.xlu0 %v1298_v20, %s1236_s25  ;;  %561 = vrot.lane.b32.xlu1 %v1300_v21, %s1236_s25 }
  0x43   : > { %654 = vrot.lane.b32.xlu0 %v1298_v20, %s1229_s19  ;;  %656 = vrot.lane.b32.xlu1 %v1300_v21, %s1229_s19 }
  0x47   : > { %749 = vrot.lane.b32.xlu0 %v1298_v20, %s1230_s20  ;;  %751 = vrot.lane.b32.xlu1 %v1300_v21, %s1230_s20 }
  0x4b   : > { %844 = vrot.lane.b32.xlu0 %v1298_v20, %s1231_s21  ;;  %846 = vrot.lane.b32.xlu1 %v1300_v21, %s1231_s21  ;;  %s1177_s21 = sshll.u32 %s1417_s13, 4 }
  0x4f   : > { %944 = vrot.lane.b32.xlu0 %v1298_v20, %s1232_s22  ;;  %946 = vrot.lane.b32.xlu1 %v1300_v21, %s1232_s22 }
  0x53   : > { %948 = vrot.lane.b32.xlu0 %v202_v29, %s1232_s22  ;;  %1045 = vrot.lane.b32.xlu1 %v1298_v20, %s1234_s24 }
  0x57   : > { %1047 = vrot.lane.b32.xlu0 %v1300_v21, %s1234_s24  ;;  %1049 = vrot.lane.b32.xlu1 %v202_v29, %s1234_s24  ;;  %s170_s24 = scalar_lea.vmem %s1415_s3, %s1177_s21 }
  0x5b   : > { %1070 = vperm.xlu0 %1213, %v1067_v30  }
  0x85   : > { %v211_v31 = vpop.permute.xlu1 %210  ;;  %v571_v32 = vpop.permute.xlu0 %570 }
  0x89   : > { %v213_v33 = vpop.permute.xlu1 %212  ;;  %v573_v34 = vpop.permute.xlu0 %572 }
  0x8a   : > { %222 = vmatprep.subr.mxu1 %v213_v33  ;;  %581 = vmatprep.subr.mxu0 %v573_v34  ;;  %v215_v37 = vsel %vm214_vm2, %v211_v31, %v213_v33  ;;  %v575_v38 = vsel %vm574_vm3, %v571_v32, %v573_v34 }
  0x8b   : > { %223 = vmatpush1.msra.mxu1 %v215_v37  ;;  %582 = vmatpush1.msra.mxu0 %v575_v38 }
  0x8c   : > { %1166 = vmatmul.mubr.msk.f32.vlgmr.msra.gmra.mrb[0].mxu0 %vm218_vm4, %v1165_v35  ;;  %1157 = vmatmul.mubr.msk.f32.vlgmr.msra.gmra.mrb[0].mxu1 %vm218_vm4, %v1156_v36 }
  0x8d   : > { %v668_v39 = vpop.permute.xlu1 %667  ;;  %v666_v40 = vpop.permute.xlu0 %665  ;;  %740 = vmatprep.mubr.f32.mxu0 %v1227_v0  ;;  %1158 = vmatprep.subr.msk.mxu1 %vm176_vm0, %v1279_v3 }
  0x8e   : > { %v670_v41 = vsel %vm669_vm5, %v666_v40, %v668_v39  ;;  %676 = vmatprep.subr.mxu0 %v668_v39  ;;  %1159 = vmatpush1.msk.msra.mxu1 %vm176_vm0, %v1273_v1  ;;  %v1163_v1 = vld [vmem:[%s1413_s1 + $0x18] sm:$0xff] }
  0x8f   : > { %677 = vmatpush1.msra.mxu0 %v670_v41  ;;  %360 = vmatprep.mubr.f32.mxu1 %v1227_v0 }
  0x91   : > { %v763_v42 = vpop.permute.xlu1 %762  ;;  %v761_v43 = vpop.permute.xlu0 %760 }
  0x92   : > { %v765_v46 = vsel %vm764_vm6, %v761_v43, %v763_v42  ;;  %771 = vmatprep.subr.mxu0 %v763_v42 }
  0x94   : > { %1168 = vmatmul.mubr.msk.f32.vlgmr.msra.gmra.mrb[0].mxu0 %vm218_vm4, %v1167_v44  ;;  %1160 = vmatmul.mubr.msk.f32.vlgmr.msra.gmra.mrb[0].mxu1 %vm218_vm4, %v203_v45 }
  0x95   : > { %772 = vmatpush1.msra.mxu0 %v765_v46  ;;  %v861_v47 = vpop.permute.xlu1 %860  ;;  %v859_v48 = vpop.permute.xlu0 %858  ;;  %835 = vmatprep.mubr.f32.mxu0 %v1227_v0 }
  0x96   : > { %v864_v49 = vsel %vm862_vm7, %v859_v48, %v861_v47  ;;  %455 = vmatprep.mubr.f32.mxu1 %v1227_v0 }
  0x97   : > { %870 = vmatprep.subr.mxu0 %v864_v49 }
  0x99   : > { %v383_v50 = vpop.permute.xlu1 %382  ;;  %v381_v51 = vpop.permute.xlu0 %380 }
  0x9a   : > { %v385_v54 = vsel %vm384_vm8, %v381_v51, %v383_v50  ;;  %391 = vmatprep.subr.mxu1 %v383_v50 }
  0x9b   : > { %392 = vmatpush1.msra.mxu1 %v385_v54 }
  0x9c   : > { %1170 = vmatmul.mubr.msk.f32.vlgmr.msra.gmra.mrb[0].mxu0 %vm218_vm4, %v1169_v52  ;;  %1162 = vmatmul.mubr.msk.f32.vlgmr.msra.gmra.mrb[0].mxu1 %vm218_vm4, %v1161_v53 }
  0x9d   : > { %v961_v55 = vpop.permute.xlu1 %960  ;;  %v857_v56 = vpop.permute.xlu0 %856  ;;  %934 = vmatprep.mubr.f32.mxu0 %v1227_v0  ;;  %550 = vmatprep.mubr.f32.mxu1 %v1227_v0 }
  0x9e   : > { %v863_v57 = vsel %vm862_vm7, %v857_v56, %v859_v48  ;;  %v1057_v48 = vlaneseq }
  0x9f   : > { %871 = vmatpush1.msra.mxu0 %v863_v57 }
  0xa0   : > { %v1058_v49 = vshrl.u32 %v1057_v48, 7 }
  0xa1   : > { %v476_v58 = vpop.permute.xlu1 %475  ;;  %v963_v59 = vpop.permute.xlu0 %962 }
  0xa2   : > { %v966_v61 = vsel %vm964_vm9, %v961_v55, %v963_v59  ;;  %v1059_v52 = vsub.s32 0, %v1058_v49 }
  0xa3   : > { %972 = vmatprep.subr.mxu0 %v966_v61 }
  0xa4   : > { %1172 = vmatmul.mubr.msk.f32.vlgmr.msra.gmra.mrb[0].mxu0 %vm218_vm4, %v1171_v60 }
  0xa5   : > { %v959_v62 = vpop.permute.xlu1 %958  ;;  %v478_v63 = vpop.permute.xlu0 %477  ;;  %1036 = vmatprep.mubr.f32.mxu0 %v1227_v0 }
  0xa6   : > { %v965_v2 = vsel %vm964_vm9, %v959_v62, %v961_v55  ;;  %v480_v3 = vsel %vm479_vm10, %v476_v58, %v478_v63  ;;  %486 = vmatprep.subr.mxu1 %v478_v63 }
  0xa7   : > { %487 = vmatpush1.msra.mxu1 %v480_v3  ;;  %973 = vmatpush1.msra.mxu0 %v965_v2 }
  0xa8   : > { %1164 = vmatmul.mubr.msk.f32.vlgmr.msra.gmra.mrb[0].mxu1 %vm218_vm4, %v1163_v1 }
  0xa9   : > { %v370_v5 = vpop.permute.xlu0 %369  ;;  %v372_v6 = vpop.permute.xlu1 %371 }
  0xaa   : > { %v373_v7 = vsel %vm214_vm2, %v370_v5, %v372_v6  ;;  %v377_v11 = vadd.f32 %v372_v6, %v1300_v21 }
  0xab   : > { %v376_v8 = vadd.f32 %v373_v7, %v1298_v20 }
  0xac   : > { %1174 = vmatmul.mubr.msk.f32.vlgmr.msra.gmra.mrb[0].mxu0 %vm218_vm4, %v1173_v4 }
  0xad   : > { %v465_v0 = vpop.permute.xlu0 %464  ;;  %v467_v9 = vpop.permute.xlu1 %466 }
  0xae   : > { %v468_v10 = vsel %vm384_vm8, %v465_v0, %v467_v9  ;;  %v472_v16 = vadd.f32 %v467_v9, %v377_v11 }
  0xaf   : > { %v471_v12 = vadd.f32 %v468_v10, %v376_v8 }
  0xb1   : > { %v560_v13 = vpop.permute.xlu0 %559  ;;  %v562_v14 = vpop.permute.xlu1 %561 }
  0xb2   : > { %v563_v15 = vsel %vm479_vm10, %v560_v13, %v562_v14  ;;  %v567_v20 = vadd.f32 %v562_v14, %v472_v16 }
  0xb3   : > { %v566_v17 = vadd.f32 %v563_v15, %v471_v12 }
  0xb5   : > { %v655_v18 = vpop.permute.xlu0 %654  ;;  %v657_v19 = vpop.permute.xlu1 %656 }
  0xb6   : > { %v658_v22 = vsel %vm574_vm3, %v655_v18, %v657_v19  ;;  %v662_v27 = vadd.f32 %v657_v19, %v567_v20 }
  0xb7   : > { %v661_v23 = vadd.f32 %v658_v22, %v566_v17 }
  0xb9   : > { %v750_v24 = vpop.permute.xlu0 %749  ;;  %v752_v25 = vpop.permute.xlu1 %751 }
  0xba   : > { %v753_v26 = vsel %vm669_vm5, %v750_v24, %v752_v25  ;;  %v757_v31 = vadd.f32 %v752_v25, %v662_v27 }
  0xbb   : > { %v756_v28 = vadd.f32 %v753_v26, %v661_v23 }
  0xbd   : > { %v845_v21 = vpop.permute.xlu0 %844  ;;  %v847_v29 = vpop.permute.xlu1 %846 }
  0xbe   : > { %v848_v30 = vsel %vm764_vm6, %v845_v21, %v847_v29  ;;  %v852_v36 = vadd.f32 %v847_v29, %v757_v31 }
  0xbf   : > { %v851_v32 = vadd.f32 %v848_v30, %v756_v28 }
  0xc1   : > { %v945_v33 = vpop.permute.xlu0 %944  ;;  %v947_v34 = vpop.permute.xlu1 %946 }
  0xc2   : > { %v950_v35 = vsel %vm862_vm7, %v945_v33, %v947_v34 }
  0xc3   : > { %v954_v37 = vadd.f32 %v950_v35, %v851_v32 }
  0xc5   : > { %v949_v38 = vpop.permute.xlu0 %948  ;;  %v1046_v39 = vpop.permute.xlu1 %1045 }
  0xc6   : > { %v951_v40 = vsel %vm862_vm7, %v947_v34, %v949_v38 }
  0xc7   : > { %v955_v41 = vadd.f32 %v951_v40, %v852_v36 }
  0xc9   : > { %v1048_v42 = vpop.permute.xlu0 %1047  ;;  %v1050_v43 = vpop.permute.xlu1 %1049 }
  0xca   : > { %v1051_v44 = vsel %vm964_vm9, %v1046_v39, %v1048_v42  ;;  %v1052_v45 = vsel %vm964_vm9, %v1048_v42, %v1050_v43 }
  0xcb   : > { %v1055_v46 = vadd.f32 %v1051_v44, %v954_v37  ;;  %v1056_v47 = vadd.f32 %v1052_v45, %v955_v41 }
  0xcd   : > { %v1060_v56 = vrot.slane %v1055_v46, %v1059_v52  ;;  %v1064_v59 = vrot.slane %v1056_v47, %v1059_v52 }
  0xda   : > { %v1071_v58 = vpop.permute.xlu0 %1070 }
 0x17b   : > { %v552_v50 = vpop.f32.mrb[0].mxu1 }
 0x17c   : > { %v554_v51 = vpop.f32.mrb[1].mxu1 }
 0x17f   : > { %v1038_v53 = vpop.f32.mrb[0].mxu0 }
 0x180   : > { %v1178_v54 = vadd.f32 %v1038_v53, %v552_v50  ;;  %v1040_v55 = vpop.f32.mrb[1].mxu0 }
 0x181   : > { %v1179_v57 = vadd.f32 %v1040_v55, %v554_v51 }
 0x182   : > { %v1065_v60 = vadd.f32 %v1178_v54, %v1060_v56 }
 0x183   : > { %v1066_v61 = vadd.f32 %v1179_v57, %v1064_v59 }
 0x184   : > { %v1073_v62 = vadd.f32 %v1071_v58, %v1065_v60 }
 0x185   : > { %v1074_v63 = vadd.f32 %v1071_v58, %v1066_v61 }
 0x186   : > { %v1075_v1 = vmax.f32 %v1073_v62, 0.0 }
 0x187   : > { %v1076_v2 = vmax.f32 %v1074_v63, 0.0 }
 0x188   : > { %1215 = vrsqrt.f32 %v1075_v1  ;;  %vm1079_vm11 = vcmp.eq.f32.partialorder %v1075_v1, inf  ;;  %v1082_v6 = vand.u32 2147483648, %v1075_v1  ;;  %vm1081_vm12 = vcmp.eq.f32.partialorder %v1075_v1, 0.0 }
 0x189   : > { %1217 = vrsqrt.f32 %v1076_v2  ;;  %vm1086_vm13 = vcmp.eq.f32.partialorder %v1076_v2, inf  ;;  %v1089_v0 = vand.u32 2147483648, %v1076_v2  ;;  %vm1088_vm14 = vcmp.eq.f32.partialorder %v1076_v2, 0.0 }
 0x192   : > { %v1216_v3 = vpop.eup %1215 }
 0x193   : > { %v1218_v4 = vpop.eup %1217  ;;  %v1078_v5 = vmul.f32 %v1216_v3, %v1075_v1 }
 0x194   : > { %v1085_v7 = vmul.f32 %v1218_v4, %v1076_v2 }
 0x195   : > { %v1080_v8 = vsel %vm1079_vm11, %v1075_v1, %v1078_v5 }
 0x196   : > { %v1083_v9 = vsel %vm1081_vm12, %v1082_v6, %v1080_v8  ;;  %v1087_v10 = vsel %vm1086_vm13, %v1076_v2, %v1085_v7 }
 0x197   : > { %v1090_v11 = vsel %vm1088_vm14, %v1089_v0, %v1087_v10  ;;  %1091 = vst [vmem:[%s170_s24] sm:$0xff] %v1083_v9 }
 0x198   : > { %1092 = vst.msk [vmem:[%s170_s24 + $0x8] sm:$0xff] %vm764_vm6, %v1090_v11 }
 0x199 PF: > { %s13_s12 = sadd.s32 1, %s1225_s12  }
 0x19a   : > { %p10_p4 = scmp.ge.s32.totalorder %s13_s12, 4  }
 0x19c   :  { %12 = sbr.rel (!%p10_p4) target bundleno = 1 (0x1), region = 70 }

</bundles_post_ra>
